<compile_context>
chip_gen: v7x
topology: tpu7x:2x2x1
jax: 0.10.0
libtpu: 0.0.40
codegen_flags: <defaults>
</compile_context>

<pallas_src>
import functools
import math

import jax
import jax.numpy as jnp
from jax import lax
from jax.experimental import pallas as pl
from jax.experimental.pallas import tpu as pltpu


def _activation(y, act):
    """Elementwise activation used both inside the kernel and in the reference."""
    if act is None:
        return y
    name = act.lower()
    if name == "relu":
        return jnp.maximum(y, 0.0)
    if name in ("lrelu", "leaky", "leakyrelu"):
        return jnp.where(y >= 0, y, 0.01 * y)
    if name == "tanh":
        return jnp.tanh(y)
    if name == "sigmoid":
        return jax.nn.sigmoid(y)
    raise NotImplementedError(f"activation {act!r} not supported")


def _rb_kernel(xcol_ref, w1_ref, b1_ref, w2_ref, b2_ref, wsc_ref, bsc_ref,
               mask_ref, out_ref, y1p_ref,
               *, KH, KW, Cin, Cout, H, W, Wp, act, shortcut_conv):
    """One batch element per grid step.

    xcol_ref : (1, KH*KW*Cin, HWv) tap-stacked flattened padded input (im2col)
    w1_ref   : (Cout, KH*KW*Cin)   fused conv1 weights
    b1_ref   : (Cout, 1)
    w2_ref   : (KH*KW, Cout, Cout) per-tap conv2 weights
    b2_ref   : (Cout, 1)
    wsc_ref  : (Cout, Cin)         1x1 shortcut weights (ignored if identity)
    bsc_ref  : (Cout, 1)
    mask_ref : (1, HWv)            1.0 on real columns, 0.0 on wrapped pad columns
    out_ref  : (1, Cout, HWv)      lane-dense flattened output (padded width Wp)
    y1p_ref  : (Cout, L) VMEM scratch = zero-padded flat conv1 output
    """
    HWv = H * Wp
    xcol = xcol_ref[0]                                   # (KH*KW*Cin, HWv)

    # ---- conv1: single fused matmul, K = KH*KW*Cin ----
    y1 = jnp.dot(w1_ref[...], xcol,
                 preferred_element_type=jnp.float32) + b1_ref[...]
    y1 = _activation(y1, act)
    # Zero the wrapped (pad-width) columns so they become the zero padding that
    # conv2 expects.  (Masking AFTER the activation keeps the border exactly 0.)
    y1 = y1 * mask_ref[...]

    # Place the activated conv1 output into a zero-filled padded flat image.
    y1p_ref[...] = jnp.zeros(y1p_ref.shape, y1p_ref.dtype)
    pad0 = (KH // 2) * Wp + (KW // 2)                    # flat offset of pixel (0,0)
    y1p_ref[:, pad0:pad0 + HWv] = y1

    # ---- conv2: KH*KW accumulating tap matmuls on lane-shifted slices ----
    acc = jnp.zeros((Cout, HWv), jnp.float32)
    for kh in range(KH):
        for kw in range(KW):
            t = kh * KW + kw
            off = kh * Wp + kw
            acc = acc + jnp.dot(w2_ref[t], y1p_ref[:, off:off + HWv],
                                preferred_element_type=jnp.float32)
    acc = acc + b2_ref[...]

    # ---- shortcut: identity (Cin == Cout) or 1x1 conv expressed as a matmul ----
    c0 = ((KH // 2) * KW + (KW // 2)) * Cin              # centre-tap rows of xcol
    xres = xcol[c0:c0 + Cin, :]                          # valid x pixels (pad cols = 0)
    if shortcut_conv:
        acc = acc + jnp.dot(wsc_ref[...], xres,
                            preferred_element_type=jnp.float32) + bsc_ref[...]
    else:
        acc = acc + xres

    out_ref[0] = acc.astype(out_ref.dtype)


def rb_forward_pallas(x, params, *, kernel_size=3, activation=None):
    """RB forward pass.  x: (N, Cin, H, W) f32.  Returns (N, Cout, H, W)."""
    N, Cin, H, W = x.shape
    Cout = params["w1"].shape[0]
    KH = KW = kernel_size
    pad = kernel_size // 2
    Hp, Wp = H + 2 * pad, W + 2 * pad
    HWv = H * Wp                      # padded-width compute grid (lane dim)
    L = Hp * Wp + (KW - 1)            # flat length with slack so all taps fit

    shortcut_conv = "w_sc" in params

    # Zero-pad spatially, flatten rows, add tail slack.
    xp = jnp.pad(x, ((0, 0), (0, 0), (pad, pad), (pad, pad)))
    xf = xp.reshape(N, Cin, Hp * Wp)
    xf = jnp.pad(xf, ((0, 0), (0, 0), (0, L - Hp * Wp)))

    # Tap-stacked (im2col) LHS for conv1: (N, KH*KW*Cin, HWv).
    offs = [kh * Wp + kw for kh in range(KH) for kw in range(KW)]
    xcol = jnp.concatenate([xf[:, :, o:o + HWv] for o in offs], axis=1)

    # Weight plumbing: fused conv1 weights, per-tap conv2 weights.
    w1f = jnp.transpose(params["w1"], (0, 2, 3, 1)).reshape(Cout, KH * KW * Cin)
    w2t = jnp.transpose(params["w2"], (2, 3, 0, 1)).reshape(KH * KW, Cout, Cout)
    b1 = params["b1"].reshape(Cout, 1).astype(jnp.float32)
    b2 = params["b2"].reshape(Cout, 1).astype(jnp.float32)
    if shortcut_conv:
        wsc = params["w_sc"].reshape(Cout, Cin).astype(jnp.float32)
        bsc = params["b_sc"].reshape(Cout, 1).astype(jnp.float32)
    else:
        wsc = jnp.zeros((Cout, Cin), jnp.float32)   # unused (identity shortcut)
        bsc = jnp.zeros((Cout, 1), jnp.float32)

    # 1.0 on real columns of the H x Wp compute grid, 0.0 on wrapped pad columns.
    col = jnp.arange(HWv, dtype=jnp.int32) % Wp
    vmask = (col < W).astype(jnp.float32).reshape(1, HWv)

    kernel = functools.partial(
        _rb_kernel, KH=KH, KW=KW, Cin=Cin, Cout=Cout, H=H, W=W, Wp=Wp,
        act=activation, shortcut_conv=shortcut_conv)

    out_flat = pl.pallas_call(
        kernel,
        out_shape=jax.ShapeDtypeStruct((N, Cout, HWv), jnp.float32),
        grid_spec=pltpu.PrefetchScalarGridSpec(
            num_scalar_prefetch=0,
            grid=(N,),
            in_specs=[
                pl.BlockSpec((1, KH * KW * Cin, HWv), lambda n: (n, 0, 0)),
                pl.BlockSpec((Cout, KH * KW * Cin), lambda n: (0, 0)),
                pl.BlockSpec((Cout, 1), lambda n: (0, 0)),
                pl.BlockSpec((KH * KW, Cout, Cout), lambda n: (0, 0, 0)),
                pl.BlockSpec((Cout, 1), lambda n: (0, 0)),
                pl.BlockSpec((Cout, Cin), lambda n: (0, 0)),
                pl.BlockSpec((Cout, 1), lambda n: (0, 0)),
                pl.BlockSpec((1, HWv), lambda n: (0, 0)),
            ],
            out_specs=pl.BlockSpec((1, Cout, HWv), lambda n: (n, 0, 0)),
            scratch_shapes=[pltpu.VMEM((Cout, L), jnp.float32)],
        ),
        compiler_params=pltpu.CompilerParams(
            dimension_semantics=("parallel",)),
    )(xcol, w1f, b1, w2t, b2, wsc, bsc, vmask)

    # (N, Cout, H*Wp) is flattened NCHW over the padded width: drop pad columns.
    return out_flat.reshape(N, Cout, H, Wp)[:, :, :, :W]


def rb_forward_ref(x, params, *, kernel_size=3, activation=None):
    """Pure-JAX NCHW reference mirroring the PyTorch RB.forward."""
    dn = ("NCHW", "OIHW", "NCHW")
    pad = kernel_size // 2

    def conv(inp, w, b, p):
        y = lax.conv_general_dilated(inp, w, (1, 1), [(p, p), (p, p)],
                                     dimension_numbers=dn,
                                     precision=lax.Precision.HIGHEST)
        return y + b[None, :, None, None]

    y = conv(x, params["w1"], params["b1"], pad)
    y = _activation(y, activation)
    y = conv(y, params["w2"], params["b2"], pad)
    if "w_sc" in params:
        sc = conv(x, params["w_sc"], params["b_sc"], 0)
    else:
        sc = x
    return y + sc


if __name__ == "__main__":
    N, H, W, K = 2, 16, 16, 3
    root = jax.random.PRNGKey(0)
    k_a, k_b = jax.random.split(root)

    def init_conv(key, cout, cin, k):
        kw_, kb_ = jax.random.split(key)
        bound = 1.0 / math.sqrt(cin * k * k)
        w = jax.random.uniform(kw_, (cout, cin, k, k), jnp.float32, -bound, bound)
        b = jax.random.uniform(kb_, (cout,), jnp.float32, -bound, bound)
        return w, b

    # --- Case 1: in_channels == out_channels (identity shortcut), relu ---
    Cio = 8
    k1, k2, kx = jax.random.split(k_a, 3)
    w1, b1 = init_conv(k1, Cio, Cio, K)
    w2, b2 = init_conv(k2, Cio, Cio, K)
    params1 = {"w1": w1, "b1": b1, "w2": w2, "b2": b2}
    x1 = jax.random.normal(kx, (N, Cio, H, W), jnp.float32)

    out1 = rb_forward_pallas(x1, params1, kernel_size=K, activation="relu")
    jax.block_until_ready(out1)
    assert out1.shape == (N, Cio, H, W)
    ref1 = rb_forward_ref(x1, params1, kernel_size=K, activation="relu")
    err1 = float(jnp.max(jnp.abs(out1 - ref1)))
    assert err1 < 5e-4, f"case1 max abs err {err1}"

    # --- Case 2: in_channels != out_channels (1x1 conv shortcut), default act=None ---
    Cin2, Cout2 = 4, 8
    k3, k4, k5, kx2 = jax.random.split(k_b, 4)
    w1b, b1b = init_conv(k3, Cout2, Cin2, K)
    w2b, b2b = init_conv(k4, Cout2, Cout2, K)
    wsc, bsc = init_conv(k5, Cout2, Cin2, 1)
    params2 = {"w1": w1b, "b1": b1b, "w2": w2b, "b2": b2b,
               "w_sc": wsc, "b_sc": bsc}
    x2 = jax.random.normal(kx2, (N, Cin2, H, W), jnp.float32)

    out2 = rb_forward_pallas(x2, params2, kernel_size=K, activation=None)
    jax.block_until_ready(out2)
    assert out2.shape == (N, Cout2, H, W)
    ref2 = rb_forward_ref(x2, params2, kernel_size=K, activation=None)
    err2 = float(jnp.max(jnp.abs(out2 - ref2)))
    assert err2 < 5e-4, f"case2 max abs err {err2}"

    print("KERNEL_OK")
</pallas_src>

<mosaic_0001>
module attributes {stable_mosaic.version = 11 : i64} {
  func.func @_rb_kernel(%arg0: i32, %arg1: memref<1x72x288xf32, #tpu.memory_space<vmem>>, %arg2: memref<8x72xf32, #tpu.memory_space<vmem>>, %arg3: memref<8x1xf32, #tpu.memory_space<vmem>>, %arg4: memref<9x8x8xf32, #tpu.memory_space<vmem>>, %arg5: memref<8x1xf32, #tpu.memory_space<vmem>>, %arg6: memref<8x8xf32, #tpu.memory_space<vmem>>, %arg7: memref<8x1xf32, #tpu.memory_space<vmem>>, %arg8: memref<1x288xf32, #tpu.memory_space<vmem>>, %arg9: memref<1x8x288xf32, #tpu.memory_space<vmem>>, %arg10: memref<8x326xf32, #tpu.memory_space<vmem>>) attributes {dimension_semantics = [#tpu.dimension_semantics<parallel>], iteration_bounds = array<i64: 2>, scalar_prefetch = 0 : i64, scratch_operands = 1 : i64, tpu.core_type = #tpu.core_type<tc>, window_params = [{transform_indices = @transform_0, window_bounds = array<i64: 1, 72, 288>}, {pipeline_mode = #tpu.pipeline_mode<synchronous>, transform_indices = @transform_1, window_bounds = array<i64: 8, 72>}, {pipeline_mode = #tpu.pipeline_mode<synchronous>, transform_indices = @transform_2, window_bounds = array<i64: 8, 1>}, {pipeline_mode = #tpu.pipeline_mode<synchronous>, transform_indices = @transform_3, window_bounds = array<i64: 9, 8, 8>}, {pipeline_mode = #tpu.pipeline_mode<synchronous>, transform_indices = @transform_4, window_bounds = array<i64: 8, 1>}, {pipeline_mode = #tpu.pipeline_mode<synchronous>, transform_indices = @transform_5, window_bounds = array<i64: 8, 8>}, {pipeline_mode = #tpu.pipeline_mode<synchronous>, transform_indices = @transform_6, window_bounds = array<i64: 8, 1>}, {pipeline_mode = #tpu.pipeline_mode<synchronous>, transform_indices = @transform_7, window_bounds = array<i64: 1, 288>}, {transform_indices = @transform_8, window_bounds = array<i64: 1, 8, 288>}]} {
    %c0 = arith.constant 0 : index
    %c0_0 = arith.constant 0 : index
    %c0_1 = arith.constant 0 : index
    %0 = vector.load %arg1[%c0, %c0_0, %c0_1] : memref<1x72x288xf32, #tpu.memory_space<vmem>>, vector<1x72x288xf32>
    %1 = vector.shape_cast %0 : vector<1x72x288xf32> to vector<72x288xf32>
    %c0_2 = arith.constant 0 : index
    %c0_3 = arith.constant 0 : index
    %2 = vector.load %arg2[%c0_2, %c0_3] : memref<8x72xf32, #tpu.memory_space<vmem>>, vector<8x72xf32>
    %cst = arith.constant dense<0.000000e+00> : vector<8x288xf32>
    %3 = tpu.matmul %2, %1, %cst {dimension_numbers = #tpu.dot_dimension_numbers<[1], [0], [0], [1], [0, 0, 1, 1], [], []>} : vector<8x72xf32>, vector<72x288xf32>, vector<8x288xf32> -> vector<8x288xf32>
    %c0_4 = arith.constant 0 : index
    %c0_5 = arith.constant 0 : index
    %4 = vector.load %arg3[%c0_4, %c0_5] : memref<8x1xf32, #tpu.memory_space<vmem>>, vector<8x1xf32>
    %5 = vector.broadcast %4 : vector<8x1xf32> to vector<8x288xf32>
    %6 = arith.addf %3, %5 : vector<8x288xf32>
    %cst_6 = arith.constant 0.000000e+00 : f32
    %7 = vector.broadcast %cst_6 : f32 to vector<8x288xf32>
    %8 = arith.maximumf %6, %7 : vector<8x288xf32>
    %c0_7 = arith.constant 0 : index
    %c0_8 = arith.constant 0 : index
    %9 = vector.load %arg8[%c0_7, %c0_8] : memref<1x288xf32, #tpu.memory_space<vmem>>, vector<1x288xf32>
    %10 = vector.broadcast %9 : vector<1x288xf32> to vector<8x288xf32>
    %11 = arith.mulf %8, %10 : vector<8x288xf32>
    %cst_9 = arith.constant 0.000000e+00 : f32
    %12 = vector.broadcast %cst_9 : f32 to vector<8x326xf32>
    %c0_10 = arith.constant 0 : index
    %c0_11 = arith.constant 0 : index
    %13 = vector.load %arg10[%c0_10, %c0_11] : memref<8x326xf32, #tpu.memory_space<vmem>>, vector<8x326xf32>
    tpu.vector_store %arg10[%c0_10, %c0_11], %12 {strides = array<i32>} : memref<8x326xf32, #tpu.memory_space<vmem>>, vector<8x326xf32>,
    %c0_12 = arith.constant 0 : index
    %c19 = arith.constant 19 : index
    %14 = vector.load %arg10[%c0_12, %c19] : memref<8x326xf32, #tpu.memory_space<vmem>>, vector<8x288xf32>
    tpu.vector_store %arg10[%c0_12, %c19], %11 {strides = array<i32>} : memref<8x326xf32, #tpu.memory_space<vmem>>, vector<8x288xf32>,
    %cst_13 = arith.constant 0.000000e+00 : f32
    %15 = vector.broadcast %cst_13 : f32 to vector<8x288xf32>
    %c0_14 = arith.constant 0 : index
    %c0_15 = arith.constant 0 : index
    %c0_16 = arith.constant 0 : index
    %16 = vector.load %arg4[%c0_14, %c0_15, %c0_16] : memref<9x8x8xf32, #tpu.memory_space<vmem>>, vector<1x8x8xf32>
    %17 = vector.shape_cast %16 : vector<1x8x8xf32> to vector<8x8xf32>
    %c0_17 = arith.constant 0 : index
    %c0_18 = arith.constant 0 : index
    %18 = vector.load %arg10[%c0_17, %c0_18] : memref<8x326xf32, #tpu.memory_space<vmem>>, vector<8x288xf32>
    %cst_19 = arith.constant dense<0.000000e+00> : vector<8x288xf32>
    %19 = tpu.matmul %17, %18, %cst_19 {dimension_numbers = #tpu.dot_dimension_numbers<[1], [0], [0], [1], [0, 0, 1, 1], [], []>} : vector<8x8xf32>, vector<8x288xf32>, vector<8x288xf32> -> vector<8x288xf32>
    %20 = arith.addf %15, %19 : vector<8x288xf32>
    %c1 = arith.constant 1 : index
    %c0_20 = arith.constant 0 : index
    %c0_21 = arith.constant 0 : index
    %21 = vector.load %arg4[%c1, %c0_20, %c0_21] : memref<9x8x8xf32, #tpu.memory_space<vmem>>, vector<1x8x8xf32>
    %22 = vector.shape_cast %21 : vector<1x8x8xf32> to vector<8x8xf32>
    %c0_22 = arith.constant 0 : index
    %c1_23 = arith.constant 1 : index
    %23 = vector.load %arg10[%c0_22, %c1_23] : memref<8x326xf32, #tpu.memory_space<vmem>>, vector<8x288xf32>
    %cst_24 = arith.constant dense<0.000000e+00> : vector<8x288xf32>
    %24 = tpu.matmul %22, %23, %cst_24 {dimension_numbers = #tpu.dot_dimension_numbers<[1], [0], [0], [1], [0, 0, 1, 1], [], []>} : vector<8x8xf32>, vector<8x288xf32>, vector<8x288xf32> -> vector<8x288xf32>
    %25 = arith.addf %20, %24 : vector<8x288xf32>
    %c2 = arith.constant 2 : index
    %c0_25 = arith.constant 0 : index
    %c0_26 = arith.constant 0 : index
    %26 = vector.load %arg4[%c2, %c0_25, %c0_26] : memref<9x8x8xf32, #tpu.memory_space<vmem>>, vector<1x8x8xf32>
    %27 = vector.shape_cast %26 : vector<1x8x8xf32> to vector<8x8xf32>
    %c0_27 = arith.constant 0 : index
    %c2_28 = arith.constant 2 : index
    %28 = vector.load %arg10[%c0_27, %c2_28] : memref<8x326xf32, #tpu.memory_space<vmem>>, vector<8x288xf32>
    %cst_29 = arith.constant dense<0.000000e+00> : vector<8x288xf32>
    %29 = tpu.matmul %27, %28, %cst_29 {dimension_numbers = #tpu.dot_dimension_numbers<[1], [0], [0], [1], [0, 0, 1, 1], [], []>} : vector<8x8xf32>, vector<8x288xf32>, vector<8x288xf32> -> vector<8x288xf32>
    %30 = arith.addf %25, %29 : vector<8x288xf32>
    %c3 = arith.constant 3 : index
    %c0_30 = arith.constant 0 : index
    %c0_31 = arith.constant 0 : index
    %31 = vector.load %arg4[%c3, %c0_30, %c0_31] : memref<9x8x8xf32, #tpu.memory_space<vmem>>, vector<1x8x8xf32>
    %32 = vector.shape_cast %31 : vector<1x8x8xf32> to vector<8x8xf32>
    %c0_32 = arith.constant 0 : index
    %c18 = arith.constant 18 : index
    %33 = vector.load %arg10[%c0_32, %c18] : memref<8x326xf32, #tpu.memory_space<vmem>>, vector<8x288xf32>
    %cst_33 = arith.constant dense<0.000000e+00> : vector<8x288xf32>
    %34 = tpu.matmul %32, %33, %cst_33 {dimension_numbers = #tpu.dot_dimension_numbers<[1], [0], [0], [1], [0, 0, 1, 1], [], []>} : vector<8x8xf32>, vector<8x288xf32>, vector<8x288xf32> -> vector<8x288xf32>
    %35 = arith.addf %30, %34 : vector<8x288xf32>
    %c4 = arith.constant 4 : index
    %c0_34 = arith.constant 0 : index
    %c0_35 = arith.constant 0 : index
    %36 = vector.load %arg4[%c4, %c0_34, %c0_35] : memref<9x8x8xf32, #tpu.memory_space<vmem>>, vector<1x8x8xf32>
    %37 = vector.shape_cast %36 : vector<1x8x8xf32> to vector<8x8xf32>
    %c0_36 = arith.constant 0 : index
    %c19_37 = arith.constant 19 : index
    %38 = vector.load %arg10[%c0_36, %c19_37] : memref<8x326xf32, #tpu.memory_space<vmem>>, vector<8x288xf32>
    %cst_38 = arith.constant dense<0.000000e+00> : vector<8x288xf32>
    %39 = tpu.matmul %37, %38, %cst_38 {dimension_numbers = #tpu.dot_dimension_numbers<[1], [0], [0], [1], [0, 0, 1, 1], [], []>} : vector<8x8xf32>, vector<8x288xf32>, vector<8x288xf32> -> vector<8x288xf32>
    %40 = arith.addf %35, %39 : vector<8x288xf32>
    %c5 = arith.constant 5 : index
    %c0_39 = arith.constant 0 : index
    %c0_40 = arith.constant 0 : index
    %41 = vector.load %arg4[%c5, %c0_39, %c0_40] : memref<9x8x8xf32, #tpu.memory_space<vmem>>, vector<1x8x8xf32>
    %42 = vector.shape_cast %41 : vector<1x8x8xf32> to vector<8x8xf32>
    %c0_41 = arith.constant 0 : index
    %c20 = arith.constant 20 : index
    %43 = vector.load %arg10[%c0_41, %c20] : memref<8x326xf32, #tpu.memory_space<vmem>>, vector<8x288xf32>
    %cst_42 = arith.constant dense<0.000000e+00> : vector<8x288xf32>
    %44 = tpu.matmul %42, %43, %cst_42 {dimension_numbers = #tpu.dot_dimension_numbers<[1], [0], [0], [1], [0, 0, 1, 1], [], []>} : vector<8x8xf32>, vector<8x288xf32>, vector<8x288xf32> -> vector<8x288xf32>
    %45 = arith.addf %40, %44 : vector<8x288xf32>
    %c6 = arith.constant 6 : index
    %c0_43 = arith.constant 0 : index
    %c0_44 = arith.constant 0 : index
    %46 = vector.load %arg4[%c6, %c0_43, %c0_44] : memref<9x8x8xf32, #tpu.memory_space<vmem>>, vector<1x8x8xf32>
    %47 = vector.shape_cast %46 : vector<1x8x8xf32> to vector<8x8xf32>
    %c0_45 = arith.constant 0 : index
    %c36 = arith.constant 36 : index
    %48 = vector.load %arg10[%c0_45, %c36] : memref<8x326xf32, #tpu.memory_space<vmem>>, vector<8x288xf32>
    %cst_46 = arith.constant dense<0.000000e+00> : vector<8x288xf32>
    %49 = tpu.matmul %47, %48, %cst_46 {dimension_numbers = #tpu.dot_dimension_numbers<[1], [0], [0], [1], [0, 0, 1, 1], [], []>} : vector<8x8xf32>, vector<8x288xf32>, vector<8x288xf32> -> vector<8x288xf32>
    %50 = arith.addf %45, %49 : vector<8x288xf32>
    %c7 = arith.constant 7 : index
    %c0_47 = arith.constant 0 : index
    %c0_48 = arith.constant 0 : index
    %51 = vector.load %arg4[%c7, %c0_47, %c0_48] : memref<9x8x8xf32, #tpu.memory_space<vmem>>, vector<1x8x8xf32>
    %52 = vector.shape_cast %51 : vector<1x8x8xf32> to vector<8x8xf32>
    %c0_49 = arith.constant 0 : index
    %c37 = arith.constant 37 : index
    %53 = vector.load %arg10[%c0_49, %c37] : memref<8x326xf32, #tpu.memory_space<vmem>>, vector<8x288xf32>
    %cst_50 = arith.constant dense<0.000000e+00> : vector<8x288xf32>
    %54 = tpu.matmul %52, %53, %cst_50 {dimension_numbers = #tpu.dot_dimension_numbers<[1], [0], [0], [1], [0, 0, 1, 1], [], []>} : vector<8x8xf32>, vector<8x288xf32>, vector<8x288xf32> -> vector<8x288xf32>
    %55 = arith.addf %50, %54 : vector<8x288xf32>
    %c8 = arith.constant 8 : index
    %c0_51 = arith.constant 0 : index
    %c0_52 = arith.constant 0 : index
    %56 = vector.load %arg4[%c8, %c0_51, %c0_52] : memref<9x8x8xf32, #tpu.memory_space<vmem>>, vector<1x8x8xf32>
    %57 = vector.shape_cast %56 : vector<1x8x8xf32> to vector<8x8xf32>
    %c0_53 = arith.constant 0 : index
    %c38 = arith.constant 38 : index
    %58 = vector.load %arg10[%c0_53, %c38] : memref<8x326xf32, #tpu.memory_space<vmem>>, vector<8x288xf32>
    %cst_54 = arith.constant dense<0.000000e+00> : vector<8x288xf32>
    %59 = tpu.matmul %57, %58, %cst_54 {dimension_numbers = #tpu.dot_dimension_numbers<[1], [0], [0], [1], [0, 0, 1, 1], [], []>} : vector<8x8xf32>, vector<8x288xf32>, vector<8x288xf32> -> vector<8x288xf32>
    %60 = arith.addf %55, %59 : vector<8x288xf32>
    %c0_55 = arith.constant 0 : index
    %c0_56 = arith.constant 0 : index
    %61 = vector.load %arg5[%c0_55, %c0_56] : memref<8x1xf32, #tpu.memory_space<vmem>>, vector<8x1xf32>
    %62 = vector.broadcast %61 : vector<8x1xf32> to vector<8x288xf32>
    %63 = arith.addf %60, %62 : vector<8x288xf32>
    %64 = vector.extract_strided_slice %1 {offsets = [32, 0], sizes = [8, 288], strides = [1, 1]} : vector<72x288xf32> to vector<8x288xf32>
    %65 = arith.addf %63, %64 : vector<8x288xf32>
    %c0_57 = arith.constant 0 : index
    %c0_58 = arith.constant 0 : index
    %c0_59 = arith.constant 0 : index
    %66 = vector.load %arg9[%c0_57, %c0_58, %c0_59] : memref<1x8x288xf32, #tpu.memory_space<vmem>>, vector<1x8x288xf32>
    %67 = vector.shape_cast %66 : vector<1x8x288xf32> to vector<8x288xf32>
    %68 = vector.shape_cast %65 : vector<8x288xf32> to vector<1x8x288xf32>
    tpu.vector_store %arg9[%c0_57, %c0_58, %c0_59], %68 {strides = array<i32>} : memref<1x8x288xf32, #tpu.memory_space<vmem>>, vector<1x8x288xf32>,
    return
  }
  func.func @transform_0(%arg0: i32) -> (i32, i32, i32) {
    %c0_i32 = arith.constant 0 : i32
    %c0_i32_0 = arith.constant 0 : i32
    %c0_i32_1 = arith.constant 0 : i32
    return %arg0, %c0_i32, %c0_i32_0 : i32, i32, i32
  }
  func.func @transform_1(%arg0: i32) -> (i32, i32) {
    %c0_i32 = arith.constant 0 : i32
    %c0_i32_0 = arith.constant 0 : i32
    %c0_i32_1 = arith.constant 0 : i32
    return %c0_i32, %c0_i32_0 : i32, i32
  }
  func.func @transform_2(%arg0: i32) -> (i32, i32) {
    %c0_i32 = arith.constant 0 : i32
    %c0_i32_0 = arith.constant 0 : i32
    %c0_i32_1 = arith.constant 0 : i32
    return %c0_i32, %c0_i32_0 : i32, i32
  }
  func.func @transform_3(%arg0: i32) -> (i32, i32, i32) {
    %c0_i32 = arith.constant 0 : i32
    %c0_i32_0 = arith.constant 0 : i32
    %c0_i32_1 = arith.constant 0 : i32
    %c0_i32_2 = arith.constant 0 : i32
    return %c0_i32, %c0_i32_0, %c0_i32_1 : i32, i32, i32
  }
  func.func @transform_4(%arg0: i32) -> (i32, i32) {
    %c0_i32 = arith.constant 0 : i32
    %c0_i32_0 = arith.constant 0 : i32
    %c0_i32_1 = arith.constant 0 : i32
    return %c0_i32, %c0_i32_0 : i32, i32
  }
  func.func @transform_5(%arg0: i32) -> (i32, i32) {
    %c0_i32 = arith.constant 0 : i32
    %c0_i32_0 = arith.constant 0 : i32
    %c0_i32_1 = arith.constant 0 : i32
    return %c0_i32, %c0_i32_0 : i32, i32
  }
  func.func @transform_6(%arg0: i32) -> (i32, i32) {
    %c0_i32 = arith.constant 0 : i32
    %c0_i32_0 = arith.constant 0 : i32
    %c0_i32_1 = arith.constant 0 : i32
    return %c0_i32, %c0_i32_0 : i32, i32
  }
  func.func @transform_7(%arg0: i32) -> (i32, i32) {
    %c0_i32 = arith.constant 0 : i32
    %c0_i32_0 = arith.constant 0 : i32
    %c0_i32_1 = arith.constant 0 : i32
    return %c0_i32, %c0_i32_0 : i32, i32
  }
  func.func @transform_8(%arg0: i32) -> (i32, i32, i32) {
    %c0_i32 = arith.constant 0 : i32
    %c0_i32_0 = arith.constant 0 : i32
    %c0_i32_1 = arith.constant 0 : i32
    return %arg0, %c0_i32, %c0_i32_0 : i32, i32, i32
  }
}

</mosaic_0001>

<bundles_post_ra>
// kernel: tpu_custom_call.1
= control target key start
LH: loop header
LB: loop body
LE: loop exit
PB: predicated region body
PF: predicated region fallthrough
CT: control target
= control target key end

     0   :  { %13 = vsyncpa [#allocation4], 0  ;;  %s2792_s0 = inlined_call_operand.hbm [shape: f32[2,72,288], index: 0, kind: input, shape index: {}]   ;;  %s2793_s1 = inlined_call_operand.vmem [shape: f32[8,72], index: 1, kind: input, shape index: {}]   ;;  %s2794_s2 = inlined_call_operand.vmem [shape: f32[8,1], index: 2, kind: input, shape index: {}]   ;;  %s2795_s3 = inlined_call_operand.vmem [shape: f32[9,8,8], index: 3, kind: input, shape index: {}]   ;;  %s2796_s4 = inlined_call_operand.vmem [shape: f32[8,1], index: 4, kind: input, shape index: {}]   ;;  %s2797_s5 = inlined_call_operand.vmem [shape: f32[8,8], index: 5, kind: input, shape index: {}]   ;;  %s2798_s6 = inlined_call_operand.vmem [shape: f32[8,1], index: 6, kind: input, shape index: {}]   ;;  %s2799_s7 = inlined_call_operand.vmem [shape: f32[1,288], index: 7, kind: input, shape index: {}]   ;;  %s2800_s8 = inlined_call_operand.hbm [shape: f32[2,8,288], index: 8, kind: output, shape index: {}]  }
   0x1   :  { %15 = vsyncpa [#allocation4 + $0x1], 0 }
   0x2   :  { %16 = vsyncpa [#allocation5], 0 }
   0x3   :  { %18 = vsyncpa [#allocation5 + $0x1], 0  ;;  %s2489_s27 = smov 0   ;;  %s2491_s28 = smov 0  }
   0x4   :  { %s2493_s29 = smov 0   ;;  %s2495_s5 = smov 0  }
   0x5 LB: > { %s2510_s6 = sadd.s32 4294967295, %s2425_s5   ;;  %s2088_s30 = sadd.s32 4294967294, %s2425_s5   ;;  %s2425_s5 = sphi %s2495_s5, %s2812_s5   ;;  %s2421_s29 = sphi %s2493_s29, %s2811_s29   ;;  %s2417_s28 = sphi %s2491_s28, %s2810_s28   ;;  %s2413_s27 = sphi %s2489_s27, %s2809_s27  }
   0x6   : > { %s2514_s9 = sadd.s32 1, %s2425_s5   ;;  %s31_s10 = sadd.s32 1, %s2421_s29 }
   0x7   : > { %s28_s11 = ssub.s32 %s2425_s5, %s2514_s9  ;;  %p38_p0 = scmp.ne.s32.totalorder %s2421_s29, %s2417_s28 }
   0x8   : > { %p29_p1 = scmp.eq.s32.totalorder %s28_s11, 0  ;;  %p39_p2 = scmp.eq.s32.totalorder %s2425_s5, 0 }
   0x9   : > { %p44_p3 = scmp.ne.s32.totalorder %s2417_s28, %s2413_s27  ;;  %p45_p4 = scmp.eq.s32.totalorder %s2510_s6, 0 }
   0xa   : > { %s2526_s12 = scalar_select %p29_p1, %s2421_s29, %s31_s10  }
   0xb   : > { %p40_p5 = por %p39_p2, %p38_p0  ;;  %p2528_p6 = por %p45_p4, %p44_p3 }
   0xc   : > { %p215_p7 = scmp.eq.s32.totalorder %s2510_s6, 1  ;;  %p221_p8 = scmp.eq.s32.totalorder %s2088_s30, 1 }
   0xd   : > { %p2279_p10 = scmp.lt.s32.totalorder %s2425_s5, 2  ;;  %s262_s16 = sand.u32 1, %s2421_s29  }
   0xe   : > { %p2535_p11 = por %p215_p7, %p38_p0  ;;  %p2539_p12 = por %p221_p8, %p44_p3 }
   0xf   : > { %s2263_s17 = smul.u32 3456, %s2425_s5  ;;  %p2550_p13 = pnand %p2279_p10, %p40_p5 }
  0x10   : > { %s2803_s14 = scalar_select %p2535_p11, 1, 0 }
  0x11   : > { %s2804_s15 = scalar_select %p2539_p12, 1, 0 }
  0x12   : > { %s2262_s18 = smul.u32 216, %s262_s16  ;;  %s2548_s21 = scalar_lea.hbm %s2792_s0, %s2263_s17 }
  0x13   : > { %s2556_s25 = scalar_lea.sflag [#allocation4], %s262_s16  ;;  %s2329_s26 = scalar_lea.hbm %s2548_s21, 3456 }
  0x14   : > { %s266_s23 = scalar_lea.vmem [#allocation3], %s2262_s18  ;;  %p2330_p0 = scmp.ne.s32.totalorder %s2548_s21, %s2329_s26 }
  0x15   : > { %s273_s24 = sshll.u32 %s266_s23, 4  ;;  %p2331_p1 = pneg %p2550_p13  ;;  %s2554_s24 = int_to_ptr.vmem [resolvable:$true] %s273_s24 }
  0x16   : > { %s2334_s11 = scalar_lea.hbm %s2792_s0, 6912  ;;  %p2335_p4 = scmp.lt.u32.totalorder %s2548_s21, %s2792_s0 }
  0x17   : > { %p2332_p2 = pnand %p2331_p1, %p2330_p0  ;;  %p2336_p5 = scmp.lt.u32.totalorder %s2334_s11, %s2329_s26 }
  0x18   : > { %p2338_p8 = scmp.lt.u32.totalorder %s2329_s26, %s2548_s21 }
  0x19   : > { %p2333_p3 = pneg %p2332_p2  ;;  %p2337_p7 = por %p2336_p5, %p2335_p4 }
  0x1b   : > { %p2339_p10 = por %p2338_p8, %p2337_p7 }
  0x1d   : > { %p2340_p9 = pnand %p2339_p10, %p2333_p3 }
  0x1f   : > { %2343 = shalt.err (!%p2340_p9)
}
  0x20   : > { %s2344_s16 = scalar_lea.vmem %s2554_s24, 3456  ;;  %s2427_s18 = smov [#allocation3]  }
  0x21   : > { %p2345_p0 = scmp.ne.s32.totalorder %s2554_s24, %s2344_s16  ;;  %s2349_s20 = sshll.u32 %s2427_s18, 4  ;;  %s2350_s20 = int_to_ptr.vmem [resolvable:$false] %s2349_s20 }
  0x22   : > { %s2351_s23 = scalar_lea.vmem %s2350_s20, 6912  ;;  %p2352_p11 = scmp.lt.s32.totalorder %s2554_s24, %s2350_s20 }
  0x23   : > { %p2347_p2 = pnand %p2345_p0, %p2331_p1  ;;  %p2353_p4 = scmp.lt.s32.totalorder %s2351_s23, %s2344_s16 }
  0x25   : > { %p2348_p12 = pneg %p2347_p2  ;;  %p2354_p5 = por %p2353_p4, %p2352_p11 }
  0x27   : > { %p2355_p7 = pnand %p2354_p5, %p2348_p12 }
  0x29   : > { %2358 = shalt.err (!%p2355_p7)
}
  0x2a   : > { %s2428_s26 = smov 384   ;;  %s2429_s30 = smov 24  }
  0x2b   : > { %2274 = dma.hbm_to_vmem [thread:$0]  (!%p2550_p13), %s2548_s21, 3456, %s2554_s24, %s2556_s25, %s2428_s26, %s2428_s26, %s2429_s30  }
  0x2c   : > { %p2092_p9 = scmp.ge.s32.totalorder %s2425_s5, 1  ;;  %p281_p1 = scmp.lt.s32.totalorder %s2425_s5, 3 }
  0x2e   : > { %p282_p3 = pnand %p2092_p9, %p281_p1 }
  0x2f   : > { %s2587_s10 = sand.u32 (!%p282_p3), 1, %s2417_s28  }
  0x30   : > { %285 = sbr.rel (%p282_p3) target bundleno = 838 (0x346), region = 52  ;;  %s288_s17 = scalar_lea.sflag (!%p282_p3), [#allocation4], %s2587_s10 }
  0x31   : > { %s2264_s11 = smul.u32 (!%p282_p3), 216, %s2587_s10 }
  0x33   : > { %s2591_s19 = scalar_lea.vmem (!%p282_p3), [#allocation3], %s2264_s11 }
  0x37   : > { %2404 = dma.done.wait (%p2528_p6), %s288_s17, 3456  }
  0x38   : > { %2406 = vsyncadd (%p2528_p6), %s288_s17, 4294963840  ;;  %v2430_v0 = vmov 0.0|0.0   ;;  %v2431_v1 = vmov 0.0   ;;  %vm2432_vm0 = vmmov 0   ;;  %v2433_v2 = vmov 0   ;;  %v325_v3 = vld [vmem:[%s2591_s19 + $0x8] sm:$0xff] }
  0x39   : > { %2234 = vmatprep.subr.bf16.mxu1 %v2430_v0  ;;  %426 = vmatprep.mubr.f32.mxu0 %v2431_v1  ;;  %526 = vst [vmem:[#allocation2] sm:$0xff] %v2431_v1  ;;  %v328_v4 = vld [vmem:[%s2591_s19 + $0x20] sm:$0xff]  ;;  %v327_v7 = vld [vmem:[%s2591_s19 + $0x18] sm:$0xff]  ;;  %v326_v8 = vld [vmem:[%s2591_s19 + $0x10] sm:$0xff]  ;;  %vm358_vm1 = vcmask 588800   ;;  %v508_v44 = vlaneseq  ;;  %vm528_vm2 = vcmask 572416  }
  0x3a   : > { %2170 = vmatprep.mubr.msk.f32.mxu1 %vm2432_vm0, %v2431_v1  ;;  %2328 = vset.pattern.permute.xlu0 %v2433_v2  ;;  %v324_v5 = vld [vmem:[%s2591_s19] sm:$0xff]  ;;  %v2218_v6 = vpack.c.bf16 %v328_v4, %v325_v3  ;;  %v329_v9 = vld [vmem:[%s2591_s19 + $0x28] sm:$0xff]  ;;  %v331_v12 = vld [vmem:[%s2591_s19 + $0x38] sm:$0xff]  ;;  %529 = vst.msk [vmem:[#allocation2 + $0x10] sm:$0xff] %vm528_vm2, %v2431_v1  ;;  %s2434_s18 = smov 19   ;;  %vm545_vm3 = vcmask 1047704  }
  0x3b   : > { %v2220_v10 = vpack.c.bf16 %v327_v7, %v324_v5  ;;  %v2235_v11 = vpack.c.bf16 %v329_v9, %v326_v8  ;;  %v334_v13 = vld [vmem:[%s2591_s19 + $0x50] sm:$0xff]  ;;  %v333_v16 = vld [vmem:[%s2591_s19 + $0x48] sm:$0xff]  ;;  %v332_v17 = vld [vmem:[%s2591_s19 + $0x40] sm:$0xff]  ;;  %v509_v45 = vshrl.u32 %v508_v44, 7  ;;  %vm539_vm4 = vcmask 154624   ;;  %s2435_s20 = smov 127  }
  0x3c   : > { %v330_v14 = vld [vmem:[%s2591_s19 + $0x30] sm:$0xff]  ;;  %2219 = vmatprep.subr.bf16.mxu0 %v2218_v6  ;;  %v2222_v15 = vpack.c.bf16 %v334_v13, %v331_v12  ;;  %v335_v18 = vld [vmem:[%s2591_s19 + $0x58] sm:$0xff]  ;;  %v2614_v21 = vld [vmem:[%s2591_s19 + $0x68] sm:$0xff]  ;;  %vm548_vm5 = vcmask 416768   ;;  %s2436_s23 = smov 126   ;;  %s2437_s26 = smov 110  }
  0x3d   : > { %2221 = vmatpush1.bf16.msra.mxu0 %v2220_v10  ;;  %2236 = vmatpush3.bf16.msra.mxu1 %v2235_v11  ;;  %v2224_v19 = vpack.c.bf16 %v333_v16, %v330_v14  ;;  %v2238_v20 = vpack.c.bf16 %v335_v18, %v332_v17  ;;  %v340_v22 = vld [vmem:[%s2591_s19 + $0x80] sm:$0xff]  ;;  %v339_v25 = vld [vmem:[%s2591_s19 + $0x78] sm:$0xff]  ;;  %v2623_v26 = vld [vmem:[%s2591_s19 + $0x70] sm:$0xff]  ;;  %v510_v46 = vsub.s32 0, %v509_v45  ;;  %v514_v49 = vsub.s32 1, %v509_v45  ;;  %s2438_s30 = smov 109  }
  0x3e   : > { %v2618_v23 = vld [vmem:[%s2591_s19 + $0x60] sm:$0xff]  ;;  %2223 = vmatprep.subr.bf16.mxu0 %v2222_v15  ;;  %2237 = vmatprep.subr.bf16.mxu1 %v2430_v0  ;;  %v2226_v24 = vpack.c.bf16 %v340_v22, %v2614_v21  ;;  %v341_v27 = vld [vmem:[%s2591_s19 + $0x88] sm:$0xff]  ;;  %v343_v28 = vld [vmem:[%s2591_s19 + $0x98] sm:$0xff]  ;;  %v518_v58 = vsub.s32 2, %v509_v45  ;;  %s2439_s11 = smov 108   ;;  %s2440_s17 = smov 92  }
  0x3f   : > { %v346_v29 = vld [vmem:[%s2591_s19 + $0xb0] sm:$0xff]  ;;  %v2228_v30 = vpack.c.bf16 %v339_v25, %v2618_v23  ;;  %v2241_v31 = vpack.c.bf16 %v341_v27, %v2623_v26  ;;  %v345_v33 = vld [vmem:[%s2591_s19 + $0xa8] sm:$0xff]  ;;  %v344_v35 = vld [vmem:[%s2591_s19 + $0xa0] sm:$0xff]  ;;  %s2442_s13 = smov 90   ;;  %vm565_vm6 = vcmask 1039360   ;;  %vm571_vm7 = vcmask 64512  }
  0x40   : > { %v342_v32 = vld [vmem:[%s2591_s19 + $0x90] sm:$0xff]  ;;  %v2230_v34 = vpack.c.bf16 %v346_v29, %v343_v28  ;;  %v347_v36 = vld [vmem:[%s2591_s19 + $0xb8] sm:$0xff]  ;;  %v349_v40 = vld [vmem:[%s2591_s19 + $0xc8] sm:$0xff]  ;;  %vm868_vm8 = vcmask 1031168   ;;  %vm1029_vm9 = vcmask 900096   ;;  %vm1190_vm10 = vcmask 891904  }
  0x41   : > { %2225 = vmatpush1.bf16.msra.mxu0 %v2224_v19  ;;  %2239 = vmatpush3.bf16.msra.mxu1 %v2238_v20  ;;  %v352_v37 = vld [vmem:[%s2794_s2] sm:$0xff]  ;;  %v2232_v38 = vpack.c.bf16 %v345_v33, %v342_v32  ;;  %v2244_v39 = vpack.c.bf16 %v347_v36, %v344_v35  ;;  %v348_v41 = vld [vmem:[%s2591_s19 + $0xc0] sm:$0xff]  ;;  %v2095_v14 = vld [vmem:[%s2795_s3 + $0x8] sm:$0xff]  ;;  %vm1351_vm11 = vcmask 883712   ;;  %vm1512_vm12 = vcmask 752640   ;;  %p2806_p11 = scmp.ne.s32.totalorder %s2803_s14, 0 }
  0x42   : > { %2227 = vmatprep.subr.bf16.mxu0 %v2226_v24  ;;  %2240 = vmatprep.subr.bf16.mxu1 %v2430_v0  ;;  %v350_v42 = vld [vmem:[%s2591_s19 + $0xd0] sm:$0xff]  ;;  %s2441_s19 = smov 91   ;;  %v2100_v28 = vld [vmem:[%s2795_s3 + $0x10] sm:$0xff]  ;;  %v2103_v32 = vld [vmem:[%s2795_s3 + $0x18] sm:$0xff]  ;;  %vm1673_vm13 = vcmask 744448   ;;  %vm1834_vm14 = vcmask 736256  }
  0x43   : > { %355 = vperm.xlu0 %2328, %v352_v37   ;;  %v351_v43 = vld [vmem:[%s2793_s1] sm:$0xff]  ;;  %v2112_v44 = vld [vmem:[%s2795_s3 + $0x30] sm:$0xff]  ;;  %vm2001_vm15 = vcmask 261120   ;;  %s2443_s21 = smov [#allocation6]  }
  0x44   : > { %v506_v48 = vld [vmem:[%s2799_s7] sm:$0x7]  ;;  %s2363_s22 = sshll.u32 %s2443_s21, 4  ;;  %s2364_s22 = int_to_ptr.vmem [resolvable:$false] %s2363_s22 }
  0x45   : > { %2229 = vmatpush1.bf16.msra.mxu0 %v2228_v30  ;;  %2242 = vmatpush3.bf16.msra.mxu1 %v2241_v31  ;;  %v511_v53 = vrot.slane %v506_v48, %v510_v46  ;;  %v515_v59 = vrot.slane %v506_v48, %v514_v49  ;;  %v1987_v11 = vld [vmem:[%s2796_s4] sm:$0xff]  ;;  %s2365_s24 = scalar_lea.vmem %s2364_s22, 768 }
  0x46   : > { %2231 = vmatprep.subr.bf16.mxu0 %v2230_v34  ;;  %2243 = vmatprep.subr.bf16.mxu1 %v2430_v0  ;;  %v519_v0 = vrot.slane %v506_v48, %v518_v58  ;;  %v550_v20 = vld [vmem:[%s2795_s3] sm:$0xff] }
  0x47   : > { %v2106_v36 = vld [vmem:[%s2795_s3 + $0x20] sm:$0xff] }
  0x49   : > { %2233 = vmatpush1.bf16.msra.mxu0 %v2232_v38  ;;  %2245 = vmatpush3.bf16.msra.mxu1 %v2244_v39 }
  0x4a   : > { %378 = vmatprep.subr.mxu0 %v349_v40  ;;  %2168 = vmatprep.subr.mxu1 %v2431_v1 }
  0x4d   : > { %379 = vmatpush1.msra.mxu0 %v348_v41  ;;  %2169 = vmatpush3.msra.mxu1 %v350_v42  ;;  %v2109_v41 = vld [vmem:[%s2795_s3 + $0x28] sm:$0xff] }
  0x4e   : > { %2093 = vmatmul.mubr.msk.f32.vlgmr.msra.gmra.mrb[0].mxu0 %vm358_vm1, %v351_v43  ;;  %2171 = vmatmul.mubr.msk.f32.vlgmr.msra.gmra.mrb[0].mxu1 %vm358_vm1, %v351_v43 }
  0x4f   : > { %2173 = vmatprep.subr.mxu1 %v2431_v1  ;;  %2175 = vmatprep.mubr.msk.f32.mxu1 %vm2432_vm0, %v2431_v1 }
  0x50   : > { %639 = vmatprep.mubr.f32.mxu0 %v2431_v1 }
  0xc2   : > { %v356_v47 = vpop.permute.xlu0 %355 }
 0x121   : > { %v428_v50 = vpop.f32.mrb[0].mxu0  ;;  %v499_v51 = vpop.f32.mrb[0].mxu1 }
 0x122   : > { %v429_v52 = vadd.f32 %v428_v50, %v356_v47  ;;  %v430_v54 = vpop.f32.mrb[1].mxu0  ;;  %v2172_v55 = vpop.f32.mrb[1].mxu1  ;;  %v500_v57 = vadd.f32 %v499_v51, %v356_v47  ;;  %v2115_v51 = vld [vmem:[%s2795_s3 + $0x38] sm:$0xff] }
 0x123   : > { %v431_v56 = vadd.f32 %v430_v54, %v356_v47 }
 0x124   : > { %v503_v60 = vmax.f32 %v429_v52, 0.0  ;;  %v505_v63 = vmax.f32 %v500_v57, 0.0 }
 0x125   : > { %v504_v61 = vmax.f32 %v431_v56, 0.0  ;;  %v2118_v56 = vld [vmem:[%s2795_s3 + $0x40] sm:$0xff] }
 0x126   : > { %v523_v62 = vmul.f32 %v511_v53, %v503_v60  ;;  %v525_v3 = vmul.f32 %v519_v0, %v505_v63 }
 0x127   : > { %v524_v2 = vmul.f32 %v515_v59, %v504_v61 }
 0x128   : > { %533 = vrot.lane.b32.xlu0 %v523_v62, %s2434_s18 }
 0x129   : > { %535 = vrot.lane.b32.xlu1 %v524_v2, %s2434_s18 }
 0x12d   : > { %537 = vrot.lane.b32.xlu1 %v525_v3, %s2434_s18 }
 0x19a   : > { %v534_v4 = vpop.permute.xlu0 %533 }
 0x19b   : > { %546 = vst.msk [vmem:[#allocation2] sm:$0xff] %vm545_vm3, %v534_v4  ;;  %v536_v5 = vpop.permute.xlu1 %535 }
 0x19c   : > { %v540_v6 = vsel %vm539_vm4, %v534_v4, %v536_v5 }
 0x19d   : > { %561 = vrot.lane.b32.xlu0 %v540_v6, %s2435_s20 }
 0x19f   : > { %v538_v7 = vpop.permute.xlu1 %537 }
 0x1a0   : > { %v541_v8 = vsel %vm539_vm4, %v536_v5, %v538_v7 }
 0x1a1   : > { %549 = vst.msk [vmem:[#allocation2 + $0x10] sm:$0xff] %vm548_vm5, %v541_v8 }
 0x1a2   : > { %v551_v9 = vld [vmem:[#allocation2] sm:$0xff] }
 0x1a3   : > { %559 = vrot.lane.b32.xlu0 %v551_v9, %s2435_s20 }
 0x1a8   : > { %v553_v10 = vld [vmem:[#allocation2 + $0x10] sm:$0xff] }
 0x1a9   : > { %563 = vrot.lane.b32.xlu1 %v553_v10, %s2435_s20  ;;  %866 = vrot.lane.b32.xlu0 %v553_v10, %s2436_s23  ;;  %s2265_s20 = smul.u32 24, %s2587_s10 }
 0x1ad   : > { %864 = vrot.lane.b32.xlu1 %v540_v6, %s2436_s23  ;;  %1025 = vrot.lane.b32.xlu0 %v540_v6, %s2437_s26 }
 0x1b1   : > { %862 = vrot.lane.b32.xlu1 %v551_v9, %s2436_s23  ;;  %1023 = vrot.lane.b32.xlu0 %v551_v9, %s2437_s26  ;;  %s323_s23 = scalar_lea.vmem [#allocation6], %s2265_s20 }
 0x1b5   : > { %1027 = vrot.lane.b32.xlu1 %v553_v10, %s2437_s26  ;;  %1188 = vrot.lane.b32.xlu0 %v553_v10, %s2438_s30  ;;  %s2266_s26 = smul.u32 384, %s2510_s6  ;;  %s2004_s6 = scalar_lea.sflag [#allocation5], %s2587_s10 }
 0x1b9   : > { %1186 = vrot.lane.b32.xlu1 %v540_v6, %s2438_s30  ;;  %1347 = vrot.lane.b32.xlu0 %v540_v6, %s2439_s11 }
 0x1bd   : > { %1184 = vrot.lane.b32.xlu1 %v551_v9, %s2438_s30  ;;  %1345 = vrot.lane.b32.xlu0 %v551_v9, %s2439_s11  ;;  %s2018_s30 = sshll.u32 %s323_s23, 4  ;;  %s2750_s30 = int_to_ptr.vmem [resolvable:$true] %s2018_s30 }
 0x1be   : > { %p2366_p8 = scmp.lt.s32.totalorder %s2750_s30, %s2364_s22 }
 0x1c1   : > { %1349 = vrot.lane.b32.xlu1 %v553_v10, %s2439_s11  ;;  %1510 = vrot.lane.b32.xlu0 %v553_v10, %s2440_s17 }
 0x1c5   : > { %1508 = vrot.lane.b32.xlu1 %v540_v6, %s2440_s17  ;;  %1669 = vrot.lane.b32.xlu0 %v540_v6, %s2441_s19 }
 0x1c9   : > { %1506 = vrot.lane.b32.xlu1 %v551_v9, %s2440_s17  ;;  %1667 = vrot.lane.b32.xlu0 %v551_v9, %s2441_s19 }
 0x1cd   : > { %1671 = vrot.lane.b32.xlu1 %v553_v10, %s2441_s19  ;;  %1832 = vrot.lane.b32.xlu0 %v553_v10, %s2442_s13  ;;  %s2748_s19 = scalar_lea.hbm %s2800_s8, %s2266_s26 }
 0x1d1   : > { %1830 = vrot.lane.b32.xlu1 %v540_v6, %s2442_s13  ;;  %1990 = vperm.xlu0 %2328, %v1987_v11  }
 0x1d5   : > { %1828 = vrot.lane.b32.xlu1 %v551_v9, %s2442_s13  ;;  %s2359_s13 = scalar_lea.vmem %s2750_s30, 384 }
 0x1d6   : > { %p2360_p6 = scmp.ne.s32.totalorder %s2750_s30, %s2359_s13  ;;  %p2367_p10 = scmp.lt.s32.totalorder %s2365_s24, %s2359_s13 }
 0x1d8   : > { %p2361_p12 = pnand %p2360_p6, %p2806_p11  ;;  %p2368_p0 = por %p2367_p10, %p2366_p8 }
 0x1da   : > { %p2362_p13 = pneg %p2361_p12 }
 0x1dc   : > { %p2369_p2 = pnand %p2368_p0, %p2362_p13 }
 0x20f   : > { %v562_v12 = vpop.permute.xlu0 %561 }
 0x215   : > { %v560_v13 = vpop.permute.xlu0 %559 }
 0x216   : > { %v566_v18 = vsel %vm565_vm6, %v560_v13, %v562_v12 }
 0x21b   : > { %v564_v15 = vpop.permute.xlu1 %563  ;;  %v867_v16 = vpop.permute.xlu0 %866 }
 0x21c   : > { %2174 = vmatpush3.msra.mxu1 %v564_v15  ;;  %v567_v17 = vsel %vm565_vm6, %v562_v12, %v564_v15 }
 0x21d   : > { %575 = vmatprep.subr.mxu0 %v567_v17  ;;  %2176 = vmatmul.mubr.msk.f32.vlgmr.msra.gmra.mrb[2].mxu1 %vm571_vm7, %v2095_v14 }
 0x21e   : > { %2178 = vmatprep.subr.mxu1 %v2431_v1  ;;  %576 = vmatpush1.msra.mxu0 %v566_v18 }
 0x21f   : > { %2179 = vmatpush3.msra.mxu1 %v553_v10  ;;  %v865_v19 = vpop.permute.xlu1 %864  ;;  %2096 = vmatmul.mubr.msk.f32.vlgmr.msra.gmra.mrb[2].mxu0 %vm571_vm7, %v2095_v14  ;;  %v1026_v22 = vpop.permute.xlu0 %1025 }
 0x220   : > { %719 = vmatprep.subr.mxu0 %v540_v6  ;;  %2180 = vmatprep.mubr.msk.f32.mxu1 %vm2432_vm0, %v2431_v1  ;;  %v870_v24 = vsel %vm868_vm8, %v865_v19, %v867_v16 }
 0x221   : > { %720 = vmatpush1.msra.mxu0 %v551_v9  ;;  %2183 = vmatprep.subr.mxu1 %v2431_v1 }
 0x222   : > { %2181 = vmatmul.mubr.msk.f32.vlgmr.msra.gmra.mrb[4].mxu1 %vm571_vm7, %v550_v20  ;;  %877 = vmatprep.subr.mxu0 %v870_v24 }
 0x223   : > { %2184 = vmatpush3.msra.mxu1 %v867_v16  ;;  %v863_v25 = vpop.permute.xlu1 %862  ;;  %783 = vmatprep.mubr.f32.mxu0 %v2431_v1  ;;  %v1024_v27 = vpop.permute.xlu0 %1023 }
 0x224   : > { %2185 = vmatprep.mubr.msk.f32.mxu1 %vm2432_vm0, %v2431_v1  ;;  %2188 = vmatprep.subr.mxu1 %v2431_v1  ;;  %v869_v29 = vsel %vm868_vm8, %v863_v25, %v865_v19  ;;  %v1030_v37 = vsel %vm1029_vm9, %v1024_v27, %v1026_v22 }
 0x226   : > { %2186 = vmatmul.mubr.msk.f32.vlgmr.msra.gmra.mrb[6].mxu1 %vm571_vm7, %v2100_v28 }
 0x227   : > { %v1028_v30 = vpop.permute.xlu1 %1027  ;;  %2098 = vmatmul.mubr.msk.f32.vlgmr.msra.gmra.mrb[2].mxu0 %vm571_vm7, %v550_v20  ;;  %2190 = vmatprep.mubr.msk.f32.mxu1 %vm2432_vm0, %v2431_v1  ;;  %v1189_v31 = vpop.permute.xlu0 %1188 }
 0x228   : > { %878 = vmatpush1.msra.mxu0 %v869_v29  ;;  %2189 = vmatpush3.msra.mxu1 %v1028_v30  ;;  %v1031_v33 = vsel %vm1029_vm9, %v1026_v22, %v1028_v30 }
 0x229   : > { %1038 = vmatprep.subr.mxu0 %v1031_v33  ;;  %2193 = vmatprep.subr.mxu1 %v2431_v1 }
 0x22a   : > { %2191 = vmatmul.mubr.msk.f32.vlgmr.msra.gmra.mrb[8].mxu1 %vm571_vm7, %v2103_v32  ;;  %941 = vmatprep.mubr.f32.mxu0 %v2431_v1 }
 0x22b   : > { %v1187_v34 = vpop.permute.xlu1 %1186  ;;  %2194 = vmatpush3.msra.mxu1 %v1189_v31  ;;  %v1348_v35 = vpop.permute.xlu0 %1347  ;;  %2195 = vmatprep.mubr.msk.f32.mxu1 %vm2432_vm0, %v2431_v1 }
 0x22c   : > { %2198 = vmatprep.subr.mxu1 %v2431_v1  ;;  %v1192_v40 = vsel %vm1190_vm10, %v1187_v34, %v1189_v31 }
 0x22e   : > { %2196 = vmatmul.mubr.msk.f32.vlgmr.msra.gmra.mrb[10].mxu1 %vm571_vm7, %v2106_v36 }
 0x22f   : > { %v1185_v38 = vpop.permute.xlu1 %1184  ;;  %2101 = vmatmul.mubr.msk.f32.vlgmr.msra.gmra.mrb[2].mxu0 %vm571_vm7, %v2100_v28  ;;  %v1346_v39 = vpop.permute.xlu0 %1345  ;;  %2200 = vmatprep.mubr.msk.f32.mxu1 %vm2432_vm0, %v2431_v1 }
 0x230   : > { %1039 = vmatpush1.msra.mxu0 %v1030_v37  ;;  %1102 = vmatprep.mubr.f32.mxu0 %v2431_v1  ;;  %v1191_v45 = vsel %vm1190_vm10, %v1185_v38, %v1187_v34  ;;  %v1352_v52 = vsel %vm1351_vm11, %v1346_v39, %v1348_v35 }
 0x231   : > { %1199 = vmatprep.subr.mxu0 %v1192_v40 }
 0x233   : > { %v1350_v42 = vpop.permute.xlu1 %1349  ;;  %v1511_v43 = vpop.permute.xlu0 %1510 }
 0x234   : > { %2199 = vmatpush3.msra.mxu1 %v1350_v42  ;;  %v1353_v48 = vsel %vm1351_vm11, %v1348_v35, %v1350_v42 }
 0x235   : > { %2203 = vmatprep.subr.mxu1 %v2431_v1  ;;  %2201 = vmatmul.mubr.msk.f32.vlgmr.msra.gmra.mrb[12].mxu1 %vm571_vm7, %v2109_v41 }
 0x236   : > { %2204 = vmatpush3.msra.mxu1 %v1511_v43  ;;  %2205 = vmatprep.mubr.msk.f32.mxu1 %vm2432_vm0, %v2431_v1 }
 0x237   : > { %v1509_v46 = vpop.permute.xlu1 %1508  ;;  %2104 = vmatmul.mubr.msk.f32.vlgmr.msra.gmra.mrb[2].mxu0 %vm571_vm7, %v2103_v32  ;;  %v1670_v47 = vpop.permute.xlu0 %1669  ;;  %2208 = vmatprep.subr.mxu1 %v2431_v1 }
 0x238   : > { %1200 = vmatpush1.msra.mxu0 %v1191_v45  ;;  %1263 = vmatprep.mubr.f32.mxu0 %v2431_v1  ;;  %v1514_v54 = vsel %vm1512_vm12, %v1509_v46, %v1511_v43 }
 0x239   : > { %1360 = vmatprep.subr.mxu0 %v1353_v48  ;;  %2206 = vmatmul.mubr.msk.f32.vlgmr.msra.gmra.mrb[14].mxu1 %vm571_vm7, %v2112_v44 }
 0x23a   : > { %2210 = vmatprep.mubr.msk.f32.mxu1 %vm2432_vm0, %v2431_v1 }
 0x23b   : > { %v1507_v49 = vpop.permute.xlu1 %1506  ;;  %v1668_v50 = vpop.permute.xlu0 %1667 }
 0x23c   : > { %v1513_v57 = vsel %vm1512_vm12, %v1507_v49, %v1509_v46  ;;  %v1674_v60 = vsel %vm1673_vm13, %v1668_v50, %v1670_v47 }
 0x23f   : > { %v1672_v53 = vpop.permute.xlu1 %1671  ;;  %2107 = vmatmul.mubr.msk.f32.vlgmr.msra.gmra.mrb[2].mxu0 %vm571_vm7, %v2106_v36  ;;  %v1833_v55 = vpop.permute.xlu0 %1832 }
 0x240   : > { %1361 = vmatpush1.msra.mxu0 %v1352_v52  ;;  %2209 = vmatpush3.msra.mxu1 %v1672_v53  ;;  %v1675_v58 = vsel %vm1673_vm13, %v1670_v47, %v1672_v53 }
 0x241   : > { %1521 = vmatprep.subr.mxu0 %v1514_v54  ;;  %2211 = vmatmul.mubr.msk.f32.vlgmr.msra.gmra.mrb[16].mxu1 %vm571_vm7, %v2115_v51 }
 0x242   : > { %2213 = vmatprep.subr.mxu1 %v2431_v1  ;;  %2215 = vmatprep.mubr.msk.f32.mxu1 %vm2432_vm0, %v2431_v1 }
 0x243   : > { %2214 = vmatpush3.msra.mxu1 %v1833_v55  ;;  %1424 = vmatprep.mubr.f32.mxu0 %v2431_v1  ;;  %v1831_v59 = vpop.permute.xlu1 %1830 }
 0x244   : > { %v1836_v61 = vsel %vm1834_vm14, %v1831_v59, %v1833_v55 }
 0x245   : > { %2216 = vmatmul.mubr.msk.f32.vlgmr.msra.gmra.mrb[18].mxu1 %vm571_vm7, %v2118_v56 }
 0x247   : > { %2110 = vmatmul.mubr.msk.f32.vlgmr.msra.gmra.mrb[2].mxu0 %vm571_vm7, %v2109_v41  ;;  %v1829_v62 = vpop.permute.xlu1 %1828 }
 0x248   : > { %1522 = vmatpush1.msra.mxu0 %v1513_v57  ;;  %1585 = vmatprep.mubr.f32.mxu0 %v2431_v1  ;;  %v1835_v63 = vsel %vm1834_vm14, %v1829_v62, %v1831_v59 }
 0x249   : > { %1682 = vmatprep.subr.mxu0 %v1675_v58 }
 0x24f   : > { %2113 = vmatmul.mubr.msk.f32.vlgmr.msra.gmra.mrb[2].mxu0 %vm571_vm7, %v2112_v44 }
 0x250   : > { %1683 = vmatpush1.msra.mxu0 %v1674_v60  ;;  %1746 = vmatprep.mubr.f32.mxu0 %v2431_v1  ;;  %v1991_v29 = vpop.permute.xlu0 %1990 }
 0x251   : > { %1843 = vmatprep.subr.mxu0 %v1836_v61 }
 0x257   : > { %2116 = vmatmul.mubr.msk.f32.vlgmr.msra.gmra.mrb[2].mxu0 %vm571_vm7, %v2115_v51 }
 0x258   : > { %1844 = vmatpush1.msra.mxu0 %v1835_v63  ;;  %1907 = vmatprep.mubr.f32.mxu0 %v2431_v1 }
 0x25f   : > { %2119 = vmatmul.mubr.msk.f32.vlgmr.msra.gmra.mrb[2].mxu0 %vm571_vm7, %v2118_v56 }
 0x2f0   : > { %v712_v0 = vpop.f32.mrb[2].mxu1 }
 0x2f1   : > { %v2177_v2 = vpop.f32.mrb[3].mxu1 }
 0x2f5   : > { %v856_v3 = vpop.f32.mrb[4].mxu1 }
 0x2f6   : > { %v857_v4 = vadd.f32 %v856_v3, %v712_v0  ;;  %v2182_v5 = vpop.f32.mrb[5].mxu1 }
 0x2f9   : > { %v1014_v6 = vpop.f32.mrb[6].mxu1 }
 0x2fa   : > { %v1020_v7 = vadd.f32 %v1014_v6, %v857_v4  ;;  %v2187_v8 = vpop.f32.mrb[7].mxu1 }
 0x2fd   : > { %v1175_v9 = vpop.f32.mrb[8].mxu1 }
 0x2fe   : > { %v1181_v10 = vadd.f32 %v1175_v9, %v1020_v7  ;;  %v2192_v11 = vpop.f32.mrb[9].mxu1 }
 0x301   : > { %v1336_v12 = vpop.f32.mrb[10].mxu1 }
 0x302   : > { %v1342_v13 = vadd.f32 %v1336_v12, %v1181_v10  ;;  %v2197_v14 = vpop.f32.mrb[11].mxu1 }
 0x308   : > { %v1497_v15 = vpop.f32.mrb[12].mxu1 }
 0x309   : > { %v1503_v16 = vadd.f32 %v1497_v15, %v1342_v13  ;;  %v2202_v1 = vpop.f32.mrb[13].mxu1 }
 0x30c   : > { %v1658_v17 = vpop.f32.mrb[14].mxu1 }
 0x30d   : > { %v1664_v18 = vadd.f32 %v1658_v17, %v1503_v16  ;;  %v2207_v19 = vpop.f32.mrb[15].mxu1 }
 0x314   : > { %v1819_v20 = vpop.f32.mrb[16].mxu1 }
 0x315   : > { %v1825_v22 = vadd.f32 %v1819_v20, %v1664_v18  ;;  %v2212_v24 = vpop.f32.mrb[17].mxu1 }
 0x318   : > { %v1980_v25 = vpop.f32.mrb[18].mxu1 }
 0x319   : > { %v1986_v27 = vadd.f32 %v1980_v25, %v1825_v22  ;;  %v2217_v28 = vpop.f32.mrb[19].mxu1 }
 0x31b   : > { %v1995_v30 = vadd.f32 %v1991_v29, %v1986_v27 }
 0x31d   : > { %v1998_v31 = vadd.f32 %v1995_v30, %v2623_v26 }
 0x31f   : > { %2002 = vst.msk [vmem:[%s323_s23 + $0x10] sm:$0xff] %vm2001_vm15, %v1998_v31 }
 0x332   : > { %v1909_v32 = vpop.f32.mrb[2].mxu0 }
 0x333   : > { %v1993_v33 = vadd.f32 %v1991_v29, %v1909_v32  ;;  %v1911_v34 = vpop.f32.mrb[3].mxu0 }
 0x334   : > { %v1994_v35 = vadd.f32 %v1991_v29, %v1911_v34 }
 0x335   : > { %v1996_v36 = vadd.f32 %v1993_v33, %v2618_v23 }
 0x336   : > { %v1997_v37 = vadd.f32 %v1994_v35, %v2614_v21 }
 0x337   : > { %1999 = vst [vmem:[%s323_s23] sm:$0xff] %v1996_v36 }
 0x338   : > { %2000 = vst [vmem:[%s323_s23 + $0x8] sm:$0xff] %v1997_v37 }
 0x339   : > { %2372 = shalt.err (!%p2369_p2)
}
 0x33a   : > { %s2373_s10 = scalar_lea.hbm %s2748_s19, 384  ;;  %s2377_s18 = scalar_lea.hbm %s2800_s8, 768 }
 0x33b   : > { %p2374_p4 = scmp.ne.s32.totalorder %s2748_s19, %s2373_s10  ;;  %p2378_p9 = scmp.lt.u32.totalorder %s2748_s19, %s2800_s8 }
 0x33c   : > { %p2379_p1 = scmp.lt.u32.totalorder %s2377_s18, %s2373_s10  ;;  %p2381_p6 = scmp.lt.u32.totalorder %s2373_s10, %s2748_s19 }
 0x33d   : > { %p2375_p5 = pnand %p2374_p4, %p2806_p11 }
 0x33e   : > { %p2380_p3 = por %p2379_p1, %p2378_p9 }
 0x33f   : > { %p2376_p7 = pneg %p2375_p5 }
 0x340   : > { %p2382_p12 = por %p2381_p6, %p2380_p3 }
 0x342   : > { %p2383_p13 = pnand %p2382_p12, %p2376_p7 }
 0x344   : > { %2386 = shalt.err (!%p2383_p13)
}
 0x345   : > { %2269 = dma.vmem_to_hbm [thread:$0]  (%p2806_p11), %s2750_s30, 384, %s2748_s19, %s2004_s6  }
 0x346 PF: > { %s2030_s26 = sand.u32 1, %s2413_s27   ;;  %p2807_p8 = scmp.ne.s32.totalorder %s2804_s15, 0 }
 0x347   : > { %p2808_p10 = scmp.ge.s32.totalorder %s2425_s5, 2  ;;  %s2031_s11 = scalar_lea.sflag [#allocation5], %s2030_s26 }
 0x349   : > { %p2276_p0 = pnand %p2808_p10, %p2807_p8 }
 0x34b   : > { %2408 = dma.done.wait (!%p2276_p0), %s2031_s11, 384  }
 0x34c   : > { %2410 = vsyncadd (!%p2276_p0), %s2031_s11, 4294966912  ;;  %p21_p2 = scmp.ge.s32.totalorder %s2514_s9, 4   ;;  %s2809_s27 = smov %s2417_s28 }
 0x34d   : > { %s2810_s28 = smov %s2421_s29  ;;  %s2811_s29 = smov %s2526_s12 }
 0x34e   : > { %s2812_s5 = smov %s2514_s9  ;;  %23 = sbr.rel (!%p21_p2) target bundleno = 5 (0x5), region = 105 }
 0x355   :  { %2036 = vsyncpa [#allocation4], 1 }
 0x356   :  { %2038 = vsyncpa [#allocation4 + $0x1], 1 }
 0x357   :  { %2039 = vsyncpa [#allocation5], 1 }
 0x358   :  { %2041 = vsyncpa [#allocation5 + $0x1], 1 }

</bundles_post_ra>
